<compile_context>
chip_gen: v5e
topology: v5e:2x2
jax: 0.10.0
libtpu: 0.0.40
codegen_flags: <defaults>
</compile_context>

<pallas_src>
import jax
import jax.numpy as jnp
from jax.experimental import pallas as pl
from jax.experimental.pallas import tpu as pltpu


_LANE = 128
_MAX_BLOCK_BYTES = 4 * 1024 * 1024     # ~4 MiB/block -> ~16 MiB for 2-in + 2-out buffers
_VMEM_LIMIT_BYTES = 48 * 1024 * 1024   # > 32 MiB default, < v7x's 64 MiB physical


def _softmax_dim0_kernel(x_ref, o_ref):
    # One (R, TILE_C) column stripe. Columns are fully independent for dim=0
    # softmax, so no cross-tile reduction is needed.
    x = x_ref[...].astype(jnp.float32)          # f32 compute (mandatory on v5e)
    m = jnp.max(x, axis=0, keepdims=True)       # numerically stable (XLU sublane reduce)
    e = jnp.exp(x - m)                          # EUP
    s = jnp.sum(e, axis=0, keepdims=True)       # XLU sublane reduce
    # EUP approx reciprocal (free slot after exp) + one Newton step -> ~exact.
    r = pl.reciprocal(s, approx=True)
    r = r * (2.0 - s * r)
    o_ref[...] = (e * r).astype(o_ref.dtype)


def _pick_tile_c(R: int, C: int, itemsize: int) -> int:
    """Largest multiple-of-128 column tile keeping one (R, TILE_C) block <= budget."""
    if C <= _LANE:
        # Full-array block (block dims == array dims), legal for any R, C.
        return C
    max_lanes = max(_MAX_BLOCK_BYTES // max(R * itemsize, 1), _LANE)
    tile_c = max(_LANE, min((max_lanes // _LANE) * _LANE, 4096))
    # Never exceed the (lane-padded) array width.
    return min(tile_c, pl.cdiv(C, _LANE) * _LANE)


def softmax_dim0(x: jax.Array) -> jax.Array:
    """softmax(x, axis=0) for a 2-D input — matches torch.nn.Softmax(dim=0)."""
    R, C = x.shape
    tile_c = _pick_tile_c(R, C, jnp.dtype(x.dtype).itemsize)
    # TODO(synk): for extremely tall R where even an (R, 128) f32 block would
    # not fit VMEM, switch to a 2-pass scheme (accumulate per-column max/sum
    # over an R-tiled "arbitrary" grid axis, then normalize) instead of
    # shrinking TILE_C below 128.
    grid_c = pl.cdiv(C, tile_c)
    return pl.pallas_call(
        _softmax_dim0_kernel,
        out_shape=jax.ShapeDtypeStruct((R, C), x.dtype),
        grid=(grid_c,),
        in_specs=[pl.BlockSpec((R, tile_c), lambda j: (0, j))],
        out_specs=pl.BlockSpec((R, tile_c), lambda j: (0, j)),
        compiler_params=pltpu.CompilerParams(
            dimension_semantics=("parallel",),
            vmem_limit_bytes=_VMEM_LIMIT_BYTES,
        ),
    )(x)


if __name__ == "__main__":
    key = jax.random.PRNGKey(0)

    # 1) Module's example shape: torch.ones(2, 2) -> single full-array block.
    x_small = jax.random.normal(key, (2, 2), dtype=jnp.float32)
    z_small = softmax_dim0(x_small)
    jax.block_until_ready(z_small)
    z_small_ref = jax.nn.softmax(x_small, axis=0)
    assert jnp.allclose(z_small, z_small_ref, atol=1e-5, rtol=1e-5), "small mismatch"
    assert jnp.allclose(jnp.sum(z_small, axis=0), jnp.ones((2,)), atol=1e-5)

    # 2) Larger shape to exercise the tiled, pipelined path (multi-tile grid
    #    with a masked last tile: C=2560 vs TILE_C=2048).
    key2 = jax.random.PRNGKey(1)
    x_big = jax.random.normal(key2, (512, 2560), dtype=jnp.float32)
    z_big = softmax_dim0(x_big)
    jax.block_until_ready(z_big)
    z_big_ref = jax.nn.softmax(x_big, axis=0)
    assert jnp.allclose(z_big, z_big_ref, atol=1e-5, rtol=1e-5), "big mismatch"
    assert jnp.allclose(jnp.sum(z_big, axis=0), jnp.ones((2560,)), atol=1e-4)

    print("KERNEL_OK")
</pallas_src>

<mosaic_0001>
module attributes {stable_mosaic.version = 11 : i64} {
  func.func @_softmax_dim0_kernel(%arg0: i32, %arg1: memref<2x2xf32, #tpu.memory_space<vmem>>, %arg2: memref<2x2xf32, #tpu.memory_space<vmem>>) attributes {dimension_semantics = [#tpu.dimension_semantics<parallel>], iteration_bounds = array<i64: 1>, scalar_prefetch = 0 : i64, scratch_operands = 0 : i64, tpu.core_type = #tpu.core_type<tc>, window_params = [{transform_indices = @transform_0, window_bounds = array<i64: 2, 2>}, {transform_indices = @transform_1, window_bounds = array<i64: 2, 2>}]} {
    %c0 = arith.constant 0 : index
    %c0_0 = arith.constant 0 : index
    %0 = vector.load %arg1[%c0, %c0_0] : memref<2x2xf32, #tpu.memory_space<vmem>>, vector<2x2xf32>
    %cst = arith.constant dense<0xFF800000> : vector<2xf32>
    %1 = vector.multi_reduction <maximumf>, %0, %cst [0] : vector<2x2xf32> to vector<2xf32>
    %2 = vector.shape_cast %1 : vector<2xf32> to vector<1x2xf32>
    %3 = vector.broadcast %2 : vector<1x2xf32> to vector<2x2xf32>
    %4 = arith.subf %0, %3 : vector<2x2xf32>
    %5 = math.exp %4 : vector<2x2xf32>
    %cst_1 = arith.constant dense<0.000000e+00> : vector<2xf32>
    %6 = vector.multi_reduction <add>, %5, %cst_1 [0] : vector<2x2xf32> to vector<2xf32>
    %7 = vector.shape_cast %6 : vector<2xf32> to vector<1x2xf32>
    %8 = tpu.reciprocal %7 {approx = true} : vector<1x2xf32> -> vector<1x2xf32>
    %9 = arith.mulf %7, %8 : vector<1x2xf32>
    %cst_2 = arith.constant 2.000000e+00 : f32
    %10 = vector.broadcast %cst_2 : f32 to vector<1x2xf32>
    %11 = arith.subf %10, %9 : vector<1x2xf32>
    %12 = arith.mulf %8, %11 : vector<1x2xf32>
    %13 = vector.broadcast %12 : vector<1x2xf32> to vector<2x2xf32>
    %14 = arith.mulf %5, %13 : vector<2x2xf32>
    %c0_3 = arith.constant 0 : index
    %c0_4 = arith.constant 0 : index
    %15 = vector.load %arg2[%c0_3, %c0_4] : memref<2x2xf32, #tpu.memory_space<vmem>>, vector<2x2xf32>
    tpu.vector_store %arg2[%c0_3, %c0_4], %14 {strides = array<i32>} : memref<2x2xf32, #tpu.memory_space<vmem>>, vector<2x2xf32>,
    return
  }
  func.func @transform_0(%arg0: i32) -> (i32, i32) {
    %c0_i32 = arith.constant 0 : i32
    %c0_i32_0 = arith.constant 0 : i32
    return %c0_i32, %arg0 : i32, i32
  }
  func.func @transform_1(%arg0: i32) -> (i32, i32) {
    %c0_i32 = arith.constant 0 : i32
    %c0_i32_0 = arith.constant 0 : i32
    return %c0_i32, %arg0 : i32, i32
  }
}

</mosaic_0001>

<bundles_post_ra>
// kernel: tpu_custom_call.1
= control target key start
LH: loop header
LB: loop body
LE: loop exit
PB: predicated region body
PF: predicated region fallthrough
CT: control target
= control target key end

     0   :  { %6 = vsyncpa [#allocation3], 0  ;;  %s144_s0 = inlined_call_operand.hbm [shape: f32[2,2], index: 0, kind: input, shape index: {}]   ;;  %s145_s1 = inlined_call_operand.hbm [shape: f32[2,2], index: 1, kind: output, shape index: {}]  }
   0x1   :  { %7 = vsyncpa [#allocation4], 0  ;;  %s13_s8 = sshll.u32 %s144_s0, 4  ;;  %s123_s9 = smov [#allocation2]   ;;  %s14_s8 = int_to_ptr.hbm [resolvable:$true] %s13_s8 }
   0x2   :  { %s15_s10 = sshll.u32 %s123_s9, 4  ;;  %s16_s10 = int_to_ptr.vmem [resolvable:$true] %s15_s10 }
   0x3   :  { %18 = dma.hbm_to_vmem [thread:$0]  %s14_s8, 32, %s16_s10, [#allocation3]  }
   0x4   :  { %119 = dma.done.wait [#allocation3], 32  }
   0x5   :  { %120 = vsyncadd [#allocation3], 4294967264  ;;  %vm24_vm0 = vcmask 9216   ;;  %v23_v0 = vld [vmem:[#allocation2] sm:$0x3]  ;;  %s124_s0 = smov [#allocation5]  }
   0x6   :  { %v25_v1 = vsel %vm24_vm0, %v23_v0, -inf  ;;  %s53_s11 = sshll.u32 %s124_s0, 4  ;;  %s55_s14 = sshll.u32 %s145_s1, 4  ;;  %s54_s11 = int_to_ptr.vmem [resolvable:$true] %s53_s11  ;;  %s56_s14 = int_to_ptr.hbm [resolvable:$true] %s55_s14 }
   0x7   :  { %v26_v2 = vrot.slane %v25_v1, 4 }
   0x9   :  { %v27_v3 = vmax.f32 %v25_v1, %v26_v2 }
   0xb   :  { %v28_v4 = vrot.slane %v27_v3, 2 }
   0xd   :  { %v29_v5 = vmax.f32 %v27_v3, %v28_v4 }
   0xf   :  { %v30_v6 = vrot.slane %v29_v5, 1 }
  0x11   :  { %v31_v7 = vmax.f32 %v29_v5, %v30_v6 }
  0x13   :  { %v32_v8 = vsub.f32 %v23_v0, %v31_v7 }
  0x15   :  { %v33_v9 = vmul.f32 1.442695, %v32_v8 }
  0x17   :  { %67 = vpow2.f32 %v33_v9 }
  0x1d   :  { %v68_v10 = vpop.eup %67 }
  0x1e   :  { %v35_v11 = vsel %vm24_vm0, %v68_v10, 0.0 }
  0x1f   :  { %v36_v12 = vrot.slane %v35_v11, 4 }
  0x21   :  { %v37_v13 = vadd.f32 %v36_v12, %v35_v11 }
  0x23   :  { %v38_v14 = vrot.slane %v37_v13, 2 }
  0x25   :  { %v39_v15 = vadd.f32 %v38_v14, %v37_v13 }
  0x27   :  { %v40_v16 = vrot.slane %v39_v15, 1 }
  0x29   :  { %v41_v17 = vadd.f32 %v40_v16, %v39_v15 }
  0x2b   :  { %69 = vrcp.f32 %v41_v17 }
  0x31   :  { %v70_v18 = vpop.eup %69 }
  0x32   :  { %v43_v19 = vmul.f32 %v70_v18, %v41_v17 }
  0x34   :  { %v44_v20 = vsub.f32 2.0, %v43_v19 }
  0x36   :  { %v45_v21 = vmul.f32 %v70_v18, %v44_v20 }
  0x38   :  { %v46_v22 = vmul.f32 %v68_v10, %v45_v21 }
  0x3a   :  { %47 = vst.msk [vmem:[#allocation5] sm:$0x3] %vm24_vm0, %v46_v22 }
  0x3b   :  { %58 = dma.vmem_to_hbm [thread:$0]  %s54_s11, 32, %s56_s14, [#allocation4]  }
  0x3c   :  { %121 = dma.done.wait [#allocation4], 32  }
  0x3d   :  { %122 = vsyncadd [#allocation4], 4294967264 }
  0x3e   :  { %63 = vsyncpa [#allocation3], 1 }
  0x3f   :  { %64 = vsyncpa [#allocation4], 1 }

</bundles_post_ra>
